<compile_context>
chip_gen: v6e
topology: v6e:2x2x1
jax: 0.10.0
libtpu: 0.0.40
codegen_flags: <defaults>
</compile_context>

<pallas_src>
import functools

import jax
import jax.numpy as jnp
from jax.experimental import pallas as pl
from jax.experimental.pallas import tpu as pltpu


def _round_up(x, m):
    return ((x + m - 1) // m) * m


def _cluster_loss_kernel(p_ref, y_ref, o_ref, acc_ref, *, margin, batch,
                         n_k, n_blocks_s, rem, mask_edge, has_dup):
    k = pl.program_id(2)  # position along this split's S-block loop

    @pl.when(k == 0)
    def _init():
        acc_ref[...] = jnp.zeros_like(acc_ref)

    # Global block index along S (the leading grid axis splits the S blocks).
    gk = pl.program_id(0) * n_k + k

    # Compute in f32 regardless of input dtype (bf16-safe long-S reduction).
    p = p_ref[...].astype(jnp.float32)      # (TB, TS)
    y = y_ref[...]                          # (TB, 1) f32 — broadcasts over lanes

    # Select-then-square: both torch branches are squared and y is 0/1, so pick
    # the pre-square value with one vselect and square once.  margin - dist ==
    # p + (margin - 1) avoids re-deriving from dist.
    d = 1.0 - p                                  # dist
    c = jnp.maximum(p + (margin - 1.0), 0.0)     # clamp(margin - dist, 0)
    t = jnp.where(y > 0.5, d, c)
    loss = t * t                                 # (TB, TS)

    def _accum(vals):
        acc_ref[...] += jnp.sum(vals, axis=-1, keepdims=True)   # (TB, 1)

    if not mask_edge and not has_dup:
        # All blocks are full and real: no masking ops on any step.
        _accum(loss)
    else:
        is_real = gk < n_blocks_s          # False only for the clamped dup block
        if mask_edge:
            is_edge = gk == n_blocks_s - 1
            full_cond = jnp.logical_not(is_edge)
            if has_dup:
                full_cond = jnp.logical_and(full_cond, is_real)

            @pl.when(full_cond)
            def _full():
                _accum(loss)

            @pl.when(is_edge)
            def _edge():
                # Mask lanes past the true sequence length (edge block only).
                lane = jax.lax.broadcasted_iota(jnp.int32, loss.shape, 1)
                _accum(jnp.where(lane < rem, loss, 0.0))
        else:
            @pl.when(is_real)
            def _full_real():
                _accum(loss)

    @pl.when(k == pl.num_programs(2) - 1)
    def _finalize():
        # Scale only the reduced (TB, 1) vector; divisor is the *global* batch.
        o_ref[...] = (acc_ref[...] * (0.5 / batch)).astype(o_ref.dtype)


def cluster_loss_1(pred_score, y, margin=1.0, *, tb=None, ts=None,
                   block_budget_bytes=None):
    """Pallas implementation of Cluster_Loss_1.forward for 2-D pred_score."""
    assert pred_score.ndim == 2, "kernel implements the 2-D branch"
    B, S = pred_score.shape

    itemsize = jnp.dtype(pred_score.dtype).itemsize
    # Sublane multiple is dtype dependent: (8,128) f32, (16,128) bf16, (32,128) int8/fp8.
    sub = {4: 8, 2: 16, 1: 32}.get(itemsize, 8)

    if block_budget_bytes is None:
        # ~8 MiB per input block -> 16 MiB double-buffered: well past the
        # >=85%-of-roofline block size on every generation, and fits v7x's
        # 64 MiB physical VMEM with ample headroom.
        block_budget_bytes = 8 << 20

    S_r = _round_up(S, 128)

    if tb is None:
        if B >= 2 * sub:
            # >= 2 batch blocks so the "parallel" batch axis can be megacore-sharded.
            tb = _round_up(-(-B // 2), sub)
        else:
            tb = _round_up(B, sub)
        tb_cap = max(sub, (block_budget_bytes // (128 * itemsize)) // sub * sub)
        tb = min(tb, tb_cap, 1024)
    else:
        tb = min(_round_up(tb, sub), _round_up(B, sub))

    if ts is None:
        # Budget-driven lane width: fill the per-block byte budget.
        ts_cap = max(128, (block_budget_bytes // (tb * itemsize)) // 128 * 128)
        ts = min(S_r, ts_cap)
    else:
        ts = min(_round_up(ts, 128), S_r)

    n_b = pl.cdiv(B, tb)
    n_blocks_s = pl.cdiv(S, ts)            # real blocks along S
    # If the batch axis collapses to one block, split the S blocks across a
    # leading "parallel" axis so both v7x TensorCores get work; the wrapper
    # sums the two per-row partials (reduction axes can't be megacore-sharded).
    n_splits = 2 if (n_b == 1 and n_blocks_s >= 2) else 1
    n_k = pl.cdiv(n_blocks_s, n_splits)
    has_dup = (n_splits * n_k) != n_blocks_s     # odd block count -> one dup block
    rem = S - (n_blocks_s - 1) * ts              # valid lanes in the edge block
    mask_edge = rem < ts

    if has_dup:
        p_map = lambda s, i, k: (i, jnp.minimum(s * n_k + k, n_blocks_s - 1))
    else:
        p_map = lambda s, i, k: (i, s * n_k + k)

    y2 = y.reshape(B, 1).astype(jnp.float32)     # tiny; keep labels in f32

    kernel = functools.partial(
        _cluster_loss_kernel, margin=float(margin), batch=B,
        n_k=n_k, n_blocks_s=n_blocks_s, rem=rem,
        mask_edge=mask_edge, has_dup=has_dup,
    )

    # VMEM: double-buffered pred block + y + f32 accumulator + output + slack.
    vmem_bytes = 2 * tb * ts * itemsize + 2 * tb * 4 + tb * 4 + 2 * tb * 4 + (2 << 20)
    vmem_limit = int(min(48 << 20, max(24 << 20, vmem_bytes)))

    grid = (n_splits, n_b, n_k)

    out = pl.pallas_call(
        kernel,
        out_shape=jax.ShapeDtypeStruct((n_splits, B, 1), jnp.float32),
        grid_spec=pltpu.PrefetchScalarGridSpec(
            num_scalar_prefetch=0,
            grid=grid,
            in_specs=[
                pl.BlockSpec((tb, ts), p_map),                 # pred_score tile
                pl.BlockSpec((tb, 1), lambda s, i, k: (i, 0)), # labels (per-row)
            ],
            # Output resident across the S (arbitrary) axis; leading dim squeezed.
            out_specs=pl.BlockSpec((None, tb, 1), lambda s, i, k: (s, i, 0)),
            scratch_shapes=[pltpu.VMEM((tb, 1), jnp.float32)],
        ),
        compiler_params=pltpu.CompilerParams(
            dimension_semantics=("parallel", "parallel", "arbitrary"),
            vmem_limit_bytes=vmem_limit,
        ),
    )(pred_score, y2)

    # Sum the (at most 2) per-split partials; output stays float32.
    return jnp.sum(out, axis=0)[:, 0]   # (B,)


def _reference(pred_score, y, margin=1.0):
    p = pred_score.astype(jnp.float32)
    yf = y.astype(jnp.float32)
    dist = 1.0 - p
    dist_sq = dist ** 2
    mdist = margin - dist
    clamped = jnp.maximum(mdist, 0.0)
    loss = yf[:, None] * dist_sq + (1.0 - yf)[:, None] * clamped ** 2
    return jnp.sum(loss, axis=-1) / 2.0 / pred_score.shape[0]


if __name__ == "__main__":
    key = jax.random.PRNGKey(0)
    k1, k2, k3, k4, k5, k6, k7, k8 = jax.random.split(key, 8)

    # 1) Primary small shape consistent with the module (B, S) + 0/1 labels.
    B, S = 4, 16
    pred_score = jax.random.uniform(k1, (B, S), dtype=jnp.float32)
    y = jax.random.bernoulli(k2, p=0.5, shape=(B,)).astype(jnp.float32)
    out = jax.block_until_ready(cluster_loss_1(pred_score, y, margin=1.0))
    ref = _reference(pred_score, y, margin=1.0)
    assert out.shape == (B,)
    assert jnp.allclose(out, ref, atol=1e-6, rtol=1e-6), (out, ref)

    # 2) Non-divisible S with a forced 2-block reduction: exercises the S-split
    #    (leading parallel axis) and edge-lane masking.
    B2, S2 = 6, 150
    p2 = jax.random.uniform(k3, (B2, S2), dtype=jnp.float32)
    y2 = jax.random.bernoulli(k4, p=0.5, shape=(B2,)).astype(jnp.float32)
    out2 = jax.block_until_ready(cluster_loss_1(p2, y2, margin=1.0, ts=128))
    ref2 = _reference(p2, y2, margin=1.0)
    assert jnp.allclose(out2, ref2, atol=1e-5, rtol=1e-5), (out2, ref2)

    # 3) Odd number of S blocks: exercises the S-split with a clamped duplicate
    #    block (skip path) plus edge masking.
    B3, S3 = 8, 2100
    p3 = jax.random.uniform(k5, (B3, S3), dtype=jnp.float32)
    y3 = jax.random.bernoulli(k6, p=0.5, shape=(B3,)).astype(jnp.float32)
    out3 = jax.block_until_ready(cluster_loss_1(p3, y3, margin=1.0, ts=256))
    ref3 = _reference(p3, y3, margin=1.0)
    assert jnp.allclose(out3, ref3, atol=1e-5, rtol=1e-5), (out3, ref3)

    # 4) Multi-block batch axis (padded batch rows) + bf16 input (dtype-aware
    #    sublane rounding, f32 accumulation and f32 output).
    B4, S4 = 40, 300
    p4 = jax.random.uniform(k7, (B4, S4), dtype=jnp.float32)
    y4 = jax.random.bernoulli(k8, p=0.5, shape=(B4,)).astype(jnp.float32)
    out4 = jax.block_until_ready(cluster_loss_1(p4, y4, margin=1.0))
    ref4 = _reference(p4, y4, margin=1.0)
    assert jnp.allclose(out4, ref4, atol=1e-5, rtol=1e-5), (out4, ref4)

    p5 = p4[:4].astype(jnp.bfloat16)
    out5 = jax.block_until_ready(cluster_loss_1(p5, y4[:4], margin=1.0))
    ref5 = _reference(p5, y4[:4], margin=1.0)
    assert out5.dtype == jnp.float32
    assert jnp.allclose(out5, ref5, atol=1e-4, rtol=1e-4), (out5, ref5)

    print("KERNEL_OK")
</pallas_src>

<mosaic_0001>
module attributes {stable_mosaic.version = 11 : i64} {
  func.func @_cluster_loss_kernel(%arg0: i32, %arg1: i32, %arg2: i32, %arg3: memref<8x128xf32, #tpu.memory_space<vmem>>, %arg4: memref<8x1xf32, #tpu.memory_space<vmem>>, %arg5: memref<1x8x1xf32, #tpu.memory_space<vmem>>, %arg6: memref<8x1xf32, #tpu.memory_space<vmem>>) attributes {dimension_semantics = [#tpu.dimension_semantics<parallel>, #tpu.dimension_semantics<parallel>, #tpu.dimension_semantics<arbitrary>], iteration_bounds = array<i64: 1, 1, 1>, scalar_prefetch = 0 : i64, scratch_operands = 1 : i64, tpu.core_type = #tpu.core_type<tc>, window_params = [{transform_indices = @transform_0, window_bounds = array<i64: 8, 128>}, {transform_indices = @transform_1, window_bounds = array<i64: 8, 1>}, {transform_indices = @transform_2, window_bounds = array<i64: 1, 8, 1>}]} {
    %c0_i32 = arith.constant 0 : i32
    %0 = arith.cmpi eq, %arg2, %c0_i32 : i32
    %1 = arith.extui %0 : i1 to i32
    %c0_i32_0 = arith.constant 0 : i32
    %2 = arith.cmpi ne, %1, %c0_i32_0 : i32
    scf.if %2 {
      %cst_12 = arith.constant 0.000000e+00 : f32
      %28 = vector.broadcast %cst_12 : f32 to vector<8x1xf32>
      %c0_13 = arith.constant 0 : index
      %c0_14 = arith.constant 0 : index
      %29 = vector.load %arg6[%c0_13, %c0_14] : memref<8x1xf32, #tpu.memory_space<vmem>>, vector<8x1xf32>
      tpu.vector_store %arg6[%c0_13, %c0_14], %28 {strides = array<i32>} : memref<8x1xf32, #tpu.memory_space<vmem>>, vector<8x1xf32>,
    } else {
    }
    %c1_i32 = arith.constant 1 : i32
    %3 = arith.muli %arg0, %c1_i32 : i32
    %4 = arith.addi %3, %arg2 : i32
    %c0 = arith.constant 0 : index
    %c0_1 = arith.constant 0 : index
    %5 = vector.load %arg3[%c0, %c0_1] : memref<8x128xf32, #tpu.memory_space<vmem>>, vector<8x128xf32>
    %c0_2 = arith.constant 0 : index
    %c0_3 = arith.constant 0 : index
    %6 = vector.load %arg4[%c0_2, %c0_3] : memref<8x1xf32, #tpu.memory_space<vmem>>, vector<8x1xf32>
    %cst = arith.constant 1.000000e+00 : f32
    %7 = vector.broadcast %cst : f32 to vector<8x128xf32>
    %8 = arith.subf %7, %5 : vector<8x128xf32>
    %cst_4 = arith.constant 0.000000e+00 : f32
    %9 = vector.broadcast %cst_4 : f32 to vector<8x128xf32>
    %10 = arith.addf %5, %9 : vector<8x128xf32>
    %cst_5 = arith.constant 0.000000e+00 : f32
    %11 = vector.broadcast %cst_5 : f32 to vector<8x128xf32>
    %12 = arith.maximumf %10, %11 : vector<8x128xf32>
    %cst_6 = arith.constant 5.000000e-01 : f32
    %13 = vector.broadcast %cst_6 : f32 to vector<8x1xf32>
    %14 = arith.cmpf ogt, %6, %13 : vector<8x1xf32>
    %15 = vector.shape_cast %14 : vector<8x1xi1> to vector<8x1xi1>
    %16 = vector.broadcast %15 : vector<8x1xi1> to vector<8x128xi1>
    %17 = arith.select %16, %8, %12 : vector<8x128xi1>, vector<8x128xf32>
    %18 = arith.mulf %17, %17 : vector<8x128xf32>
    %c0_i32_7 = arith.constant 0 : i32
    %19 = arith.cmpi eq, %4, %c0_i32_7 : i32
    %true = arith.constant true
    %20 = arith.xori %19, %true : i1
    %21 = arith.extui %20 : i1 to i32
    %c0_i32_8 = arith.constant 0 : i32
    %22 = arith.cmpi ne, %21, %c0_i32_8 : i32
    scf.if %22 {
      %c0_12 = arith.constant 0 : index
      %c0_13 = arith.constant 0 : index
      %28 = vector.load %arg6[%c0_12, %c0_13] : memref<8x1xf32, #tpu.memory_space<vmem>>, vector<8x1xf32>
      %cst_14 = arith.constant dense<0.000000e+00> : vector<8xf32>
      %29 = vector.multi_reduction <add>, %18, %cst_14 [1] : vector<8x128xf32> to vector<8xf32>
      %30 = vector.shape_cast %29 : vector<8xf32> to vector<8x1xf32>
      %31 = arith.addf %28, %30 : vector<8x1xf32>
      %c0_15 = arith.constant 0 : index
      %c0_16 = arith.constant 0 : index
      %32 = vector.load %arg6[%c0_15, %c0_16] : memref<8x1xf32, #tpu.memory_space<vmem>>, vector<8x1xf32>
      tpu.vector_store %arg6[%c0_15, %c0_16], %31 {strides = array<i32>} : memref<8x1xf32, #tpu.memory_space<vmem>>, vector<8x1xf32>,
    } else {
    }
    %23 = arith.extui %19 : i1 to i32
    %c0_i32_9 = arith.constant 0 : i32
    %24 = arith.cmpi ne, %23, %c0_i32_9 : i32
    scf.if %24 {
      %28 = tpu.iota {dimensions = array<i32: 1>} : vector<8x128xi32>
      %c16_i32 = arith.constant 16 : i32
      %29 = vector.broadcast %c16_i32 : i32 to vector<8x128xi32>
      %30 = arith.cmpi slt, %28, %29 : vector<8x128xi32>
      %cst_12 = arith.constant 0.000000e+00 : f32
      %31 = vector.broadcast %cst_12 : f32 to vector<8x128xf32>
      %32 = arith.select %30, %18, %31 : vector<8x128xi1>, vector<8x128xf32>
      %c0_13 = arith.constant 0 : index
      %c0_14 = arith.constant 0 : index
      %33 = vector.load %arg6[%c0_13, %c0_14] : memref<8x1xf32, #tpu.memory_space<vmem>>, vector<8x1xf32>
      %cst_15 = arith.constant dense<0.000000e+00> : vector<8xf32>
      %34 = vector.multi_reduction <add>, %32, %cst_15 [1] : vector<8x128xf32> to vector<8xf32>
      %35 = vector.shape_cast %34 : vector<8xf32> to vector<8x1xf32>
      %36 = arith.addf %33, %35 : vector<8x1xf32>
      %c0_16 = arith.constant 0 : index
      %c0_17 = arith.constant 0 : index
      %37 = vector.load %arg6[%c0_16, %c0_17] : memref<8x1xf32, #tpu.memory_space<vmem>>, vector<8x1xf32>
      tpu.vector_store %arg6[%c0_16, %c0_17], %36 {strides = array<i32>} : memref<8x1xf32, #tpu.memory_space<vmem>>, vector<8x1xf32>,
    } else {
    }
    %c0_i32_10 = arith.constant 0 : i32
    %25 = arith.cmpi eq, %arg2, %c0_i32_10 : i32
    %26 = arith.extui %25 : i1 to i32
    %c0_i32_11 = arith.constant 0 : i32
    %27 = arith.cmpi ne, %26, %c0_i32_11 : i32
    scf.if %27 {
      %c0_12 = arith.constant 0 : index
      %c0_13 = arith.constant 0 : index
      %28 = vector.load %arg6[%c0_12, %c0_13] : memref<8x1xf32, #tpu.memory_space<vmem>>, vector<8x1xf32>
      %cst_14 = arith.constant 1.250000e-01 : f32
      %29 = vector.broadcast %cst_14 : f32 to vector<8x1xf32>
      %30 = arith.mulf %28, %29 : vector<8x1xf32>
      %c0_15 = arith.constant 0 : index
      %c0_16 = arith.constant 0 : index
      %c0_17 = arith.constant 0 : index
      %31 = vector.load %arg5[%c0_15, %c0_16, %c0_17] : memref<1x8x1xf32, #tpu.memory_space<vmem>>, vector<1x8x1xf32>
      %32 = vector.shape_cast %31 : vector<1x8x1xf32> to vector<8x1xf32>
      %33 = vector.shape_cast %30 : vector<8x1xf32> to vector<1x8x1xf32>
      tpu.vector_store %arg5[%c0_15, %c0_16, %c0_17], %33 {strides = array<i32>} : memref<1x8x1xf32, #tpu.memory_space<vmem>>, vector<1x8x1xf32>,
    } else {
    }
    return
  }
  func.func @transform_0(%arg0: i32, %arg1: i32, %arg2: i32) -> (i32, i32) {
    %c1_i32 = arith.constant 1 : i32
    %0 = arith.muli %arg0, %c1_i32 : i32
    %1 = arith.addi %0, %arg2 : i32
    %c0_i32 = arith.constant 0 : i32
    return %arg1, %1 : i32, i32
  }
  func.func @transform_1(%arg0: i32, %arg1: i32, %arg2: i32) -> (i32, i32) {
    %c0_i32 = arith.constant 0 : i32
    %c0_i32_0 = arith.constant 0 : i32
    return %arg1, %c0_i32 : i32, i32
  }
  func.func @transform_2(%arg0: i32, %arg1: i32, %arg2: i32) -> (i32, i32, i32) {
    %c0_i32 = arith.constant 0 : i32
    %c0_i32_0 = arith.constant 0 : i32
    return %arg0, %arg1, %c0_i32 : i32, i32, i32
  }
}

</mosaic_0001>

<bundles_post_ra>
// kernel: tpu_custom_call.1
= control target key start
LH: loop header
LB: loop body
LE: loop exit
PB: predicated region body
PF: predicated region fallthrough
CT: control target
= control target key end

     0   :  { %v129_v1 = vmov 0   ;;  %v62_v3 = vlaneseq  ;;  %vm32_vm3 = vcmask 7168   ;;  %v130_v12 = vmov 0.0   ;;  %s155_s0 = inlined_call_operand.vmem [shape: f32[4,16], index: 0, kind: input, shape index: {}]   ;;  %s156_s1 = inlined_call_operand.vmem [shape: f32[4,1], index: 1, kind: input, shape index: {}]   ;;  %s157_s2 = inlined_call_operand.vmem [shape: f32[1,4,1], index: 2, kind: output, shape index: {}]  }
   0x1   :  { %v36_v0 = vld [vmem:[%s156_s1] sm:$0xff]  ;;  %128 = vset.pattern.permute.xlu0 %v129_v1  ;;  %33 = vst.msk [vmem:[#allocation2] sm:$0xff] %vm32_vm3, %v130_v12 }
   0x2   :  { %vm40_vm0 = vcmp.gt.f32.partialorder %v36_v0, 0.5  ;;  %v35_v4 = vld [vmem:[%s155_s0] sm:$0xff]  ;;  %v63_v7 = vand.u32 127, %v62_v3 }
   0x3   :  { %v41_v2 = vsel %vm40_vm0, 1, %v129_v1  ;;  %v37_v5 = vsub.f32 1.0, %v35_v4  ;;  %v39_v6 = vmax.f32 %v35_v4, 0.0 }
   0x4   :  { %43 = vperm.xlu0 %128, %v41_v2   ;;  %vm64_vm2 = vcmp.lt.s32.totalorder %v63_v7, 16 }
   0x8   :  { %v66_v13 = vld [vmem:[#allocation2] sm:$0xff] }
  0x7f   :  { %v44_v8 = vpop.permute.xlu0 %43 }
  0x80   :  { %vm45_vm1 = vcmp.eq.s32.totalorder %v44_v8, 1 }
  0x81   :  { %v46_v9 = vsel %vm45_vm1, %v37_v5, %v39_v6 }
  0x82   :  { %v47_v10 = vmul.f32 %v46_v9, %v46_v9 }
  0x84   :  { %v65_v11 = vsel %vm64_vm2, %v47_v10, 0.0 }
  0x85   :  { %67 = vadd.xlane.f32.xlu0 %v65_v11 }
 0x10e   :  { %v68_v14 = vpop.xlane.xlu0 %67 }
 0x10f   :  { %v69_v15 = vadd.f32 %v68_v14, %v66_v13 }
 0x111   :  { %71 = vst.msk [vmem:[#allocation2] sm:$0xff] %vm32_vm3, %v69_v15 }
 0x118   :  { %v75_v16 = vld [vmem:[#allocation2] sm:$0xff] }
 0x119   :  { %v76_v17 = vmul.f32 0.125, %v75_v16 }
 0x11b   :  { %78 = vst.msk [vmem:[#allocation3] sm:$0xff] %vm32_vm3, %v76_v17 }
 0x122   :  { %v97_v18 = vld [vmem:[#allocation3] sm:$0xf] }
 0x123   :  { %98 = vst [vmem:[%s157_s2] sm:$0xf] %v97_v18 }

</bundles_post_ra>
